<compile_context>
chip_gen: v7x
topology: tpu7x:2x2x1
jax: 0.10.0
libtpu: 0.0.40
codegen_flags: <defaults>
</compile_context>

<pallas_src>
import jax
import jax.numpy as jnp
from jax.experimental import pallas as pl
from jax.experimental.pallas import tpu as pltpu


# ----------------------------- kernels ------------------------------------ #

def _tf_mode_kernel(x_ref, o_ref):
    # 'tensorflow' mode: [0, 1] -> [-1, 1]
    x = x_ref[...].astype(jnp.float32)
    o_ref[...] = (x * 2.0 - 1.0).astype(o_ref.dtype)


def _torch_mode_kernel(x_ref, scale_ref, bias_ref, o_ref):
    # 'torch' mode: (x - mean[c]) / std[c] == x * (1/std[c]) + (-mean[c]/std[c])
    # scale_ref / bias_ref are either (block_rows, 1) per-row factors or
    # (1, block_cols) per-lane factors; jnp broadcasting covers both layouts.
    x = x_ref[...].astype(jnp.float32)
    o_ref[...] = (x * scale_ref[...] + bias_ref[...]).astype(o_ref.dtype)


# ------------------------ generation-aware tuning --------------------------- #

def _tpu_params():
    """(block_target_bytes, vmem_limit_bytes) picked per TPU generation.

    Defaults are v7x-safe (64 MiB VMEM per TC); v5e/v6e (128 MiB) get bigger
    blocks + a higher scoped-VMEM limit to amortize per-grid-step overhead.
    """
    target_bytes = 4 * 1024 * 1024
    vmem_limit = 32 * 1024 * 1024
    try:
        vmem = pltpu.get_tpu_info().vmem_capacity_bytes
        if vmem >= 96 * 1024 * 1024:          # v5e / v6e
            target_bytes = 8 * 1024 * 1024
            vmem_limit = 64 * 1024 * 1024
    except Exception:
        pass                                   # keep conservative defaults
    return target_bytes, vmem_limit


# --------------------------- tiling helpers --------------------------------- #

def _choose_block(rows, cols, itemsize, target_bytes):
    """Pick a lane-dense (block_rows, block_cols) tile of ~target_bytes.

    Double-buffered in+out (~4x block) stays well under the scoped-VMEM limit.
    Sublane rounding is dtype-aware (8/16/32 for 4/2/1-byte elements).
    """
    sub = 8 * max(1, 4 // itemsize)            # native sublane tile for dtype

    # Lane (last) dim: full extent when it fits the budget, else a large
    # multiple of 128 (unmasked full-width vst).
    if cols <= 128 or cols * itemsize * sub <= target_bytes:
        bc = cols                              # full extent (always legal)
    else:
        bc = (target_bytes // (sub * itemsize)) // 128 * 128
        bc = max(128, min(bc, (cols // 128) * 128))

    # Sublane (second-to-last) dim: fill the rest of the budget.
    rows_budget = max(1, target_bytes // (bc * itemsize))
    if rows <= max(sub, rows_budget):
        br = rows                              # full extent
    else:
        br = max(sub, (rows_budget // sub) * sub)

    # v7x has 2 TensorCores: make sure non-trivial inputs have >= 2 grid steps
    # along a "parallel" axis so both cores get work.
    if (rows * cols * itemsize >= (1 << 20)
            and pl.cdiv(rows, br) == 1 and pl.cdiv(cols, bc) == 1):
        if rows >= 2 * sub:
            br = max(sub, ((rows + 1) // 2 // sub) * sub)
        elif cols >= 256 and cols % 128 == 0:
            bc = max(128, ((cols // 2) // 128) * 128)
    return br, bc


def _flatten_channel_agnostic(total, lane_target=8192):
    """(rows, cols) with rows*cols == total and cols a multiple of 128.

    Returns None if total is not a multiple of 128 (caller falls back).
    Used for 'tensorflow' mode, which has no per-channel parameters, so any
    2-D view is valid; picking cols as a big multiple of 128 guarantees
    unmasked full-width stores for every input shape (7x7, odd crops, ...).
    """
    if total % 128 != 0:
        return None
    m = total // 128
    t = max(1, lane_target // 128)
    d = 1
    for cand in range(min(m, t), 0, -1):       # <= 64 iterations
        if m % cand == 0:
            d = cand
            break
    cols = 128 * d
    return total // cols, cols


# ----------------------------- wrapper ------------------------------------ #

def tf_normalize(x, mean=0.0, std=1.0, mode="tensorflow"):
    """Pallas implementation of TfNormalize.forward for NCHW inputs."""
    N, C, H, W = x.shape
    total = N * C * H * W
    itemsize = jnp.dtype(x.dtype).itemsize
    # Integer/uint8 inputs would be truncated to garbage if written back in the
    # input dtype; produce float32 instead.
    out_dtype = x.dtype if jnp.issubdtype(x.dtype, jnp.floating) else jnp.float32
    out_itemsize = jnp.dtype(out_dtype).itemsize

    target_bytes, vmem_limit = _tpu_params()
    cparams = pltpu.CompilerParams(
        dimension_semantics=("parallel", "parallel"),
        vmem_limit_bytes=vmem_limit,
    )

    if mode == "tensorflow":
        # Channel-agnostic flattening: any 2-D view is valid in this mode.
        shape2d = _flatten_channel_agnostic(total)
        if shape2d is None:
            shape2d = (N * C, H * W)           # fallback for odd totals
        rows, cols = shape2d
        x2d = x.reshape(rows, cols)

        br, bc = _choose_block(rows, cols, itemsize, target_bytes)
        grid = (pl.cdiv(rows, br), pl.cdiv(cols, bc))
        cost = pl.CostEstimate(
            flops=2 * total, transcendentals=0,
            bytes_accessed=total * (itemsize + out_itemsize))

        out2d = pl.pallas_call(
            _tf_mode_kernel,
            out_shape=jax.ShapeDtypeStruct((rows, cols), out_dtype),
            grid_spec=pltpu.PrefetchScalarGridSpec(
                num_scalar_prefetch=0,
                grid=grid,
                in_specs=[pl.BlockSpec((br, bc), lambda i, j: (i, j))],
                out_specs=pl.BlockSpec((br, bc), lambda i, j: (i, j)),
            ),
            compiler_params=cparams,
            cost_estimate=cost,
        )(x2d)

    elif mode == "torch":
        mean = jnp.broadcast_to(jnp.asarray(mean, jnp.float32), (C,))
        std = jnp.broadcast_to(jnp.asarray(std, jnp.float32), (C,))
        scale_c = 1.0 / std                    # hoisted out of the kernel
        bias_c = -mean / std

        hw = H * W
        if hw % 128 == 0:
            # Lane-dense (N*C, H*W) view with per-row (channel) constants that
            # broadcast across lanes.
            rows, cols = N * C, hw
            x2d = x.reshape(rows, cols)
            scale_arr = jnp.tile(scale_c, N).reshape(rows, 1)
            bias_arr = jnp.tile(bias_c, N).reshape(rows, 1)
            br, bc = _choose_block(rows, cols, itemsize, target_bytes)
            vec_spec = pl.BlockSpec((br, 1), lambda i, j: (i, 0))
            side_bytes = 2 * rows * 4
        else:
            # Small / non-128-multiple H*W: (N, C*H*W) view + tiny (1, C*H*W)
            # scale/bias band broadcast across sublanes -> lane dim stays as
            # wide as possible and stores stay dense.
            rows, cols = N, C * hw
            x2d = x.reshape(rows, cols)
            scale_arr = jnp.repeat(scale_c, hw).reshape(1, cols)
            bias_arr = jnp.repeat(bias_c, hw).reshape(1, cols)
            br, bc = _choose_block(rows, cols, itemsize, target_bytes)
            vec_spec = pl.BlockSpec((1, bc), lambda i, j: (0, j))
            side_bytes = 2 * cols * 4

        grid = (pl.cdiv(rows, br), pl.cdiv(cols, bc))
        x_spec = pl.BlockSpec((br, bc), lambda i, j: (i, j))
        out_spec = pl.BlockSpec((br, bc), lambda i, j: (i, j))
        cost = pl.CostEstimate(
            flops=2 * total, transcendentals=0,
            bytes_accessed=total * (itemsize + out_itemsize) + side_bytes)

        out2d = pl.pallas_call(
            _torch_mode_kernel,
            out_shape=jax.ShapeDtypeStruct((rows, cols), out_dtype),
            grid_spec=pltpu.PrefetchScalarGridSpec(
                num_scalar_prefetch=0,
                grid=grid,
                in_specs=[x_spec, vec_spec, vec_spec],
                out_specs=out_spec,
            ),
            compiler_params=cparams,
            cost_estimate=cost,
        )(x2d, scale_arr, bias_arr)

    else:
        raise ValueError(f"unknown mode: {mode}")

    return out2d.reshape(N, C, H, W)


# ------------------------------ main --------------------------------------- #

if __name__ == "__main__":
    key = jax.random.PRNGKey(0)
    N, C, H, W = 2, 4, 16, 16
    x = jax.random.uniform(key, (N, C, H, W), dtype=jnp.float32)   # data in [0,1]

    # --- 'tensorflow' mode (module default), H*W multiple of 128 ---
    out_tf = jax.block_until_ready(tf_normalize(x, mode="tensorflow"))
    ref_tf = x * 2.0 - 1.0
    assert jnp.allclose(out_tf, ref_tf, atol=1e-6), "tensorflow mode mismatch"

    # --- 'torch' mode, deterministic per-channel mean/std ---
    mean = jnp.array([0.1, 0.2, 0.3, 0.4], dtype=jnp.float32)
    std = jnp.array([0.5, 0.6, 0.7, 0.8], dtype=jnp.float32)
    out_th = jax.block_until_ready(tf_normalize(x, mean=mean, std=std, mode="torch"))
    ref_th = (x - mean[None, :, None, None]) / std[None, :, None, None]
    assert jnp.allclose(out_th, ref_th, atol=1e-5), "torch mode mismatch"

    # --- non-128-multiple spatial size (7x7) exercises the alternate views ---
    x_odd = jax.random.uniform(jax.random.PRNGKey(1), (2, 4, 7, 7), dtype=jnp.float32)
    out_tf2 = jax.block_until_ready(tf_normalize(x_odd, mode="tensorflow"))
    assert jnp.allclose(out_tf2, x_odd * 2.0 - 1.0, atol=1e-6), "tf odd-shape mismatch"
    out_th2 = jax.block_until_ready(tf_normalize(x_odd, mean=mean, std=std, mode="torch"))
    ref_th2 = (x_odd - mean[None, :, None, None]) / std[None, :, None, None]
    assert jnp.allclose(out_th2, ref_th2, atol=1e-5), "torch odd-shape mismatch"

    print("KERNEL_OK")
</pallas_src>

<mosaic_0001>
module attributes {stable_mosaic.version = 11 : i64} {
  func.func @_tf_mode_kernel(%arg0: i32, %arg1: i32, %arg2: memref<1x2048xf32, #tpu.memory_space<vmem>>, %arg3: memref<1x2048xf32, #tpu.memory_space<vmem>>) attributes {dimension_semantics = [#tpu.dimension_semantics<parallel>, #tpu.dimension_semantics<parallel>], iteration_bounds = array<i64: 1, 1>, scalar_prefetch = 0 : i64, scratch_operands = 0 : i64, tpu.core_type = #tpu.core_type<tc>, window_params = [{transform_indices = @transform_0, window_bounds = array<i64: 1, 2048>}, {transform_indices = @transform_1, window_bounds = array<i64: 1, 2048>}]} {
    %c0 = arith.constant 0 : index
    %c0_0 = arith.constant 0 : index
    %0 = vector.load %arg2[%c0, %c0_0] : memref<1x2048xf32, #tpu.memory_space<vmem>>, vector<1x2048xf32>
    %cst = arith.constant 2.000000e+00 : f32
    %1 = vector.broadcast %cst : f32 to vector<1x2048xf32>
    %2 = arith.mulf %0, %1 : vector<1x2048xf32>
    %cst_1 = arith.constant 1.000000e+00 : f32
    %3 = vector.broadcast %cst_1 : f32 to vector<1x2048xf32>
    %4 = arith.subf %2, %3 : vector<1x2048xf32>
    %c0_2 = arith.constant 0 : index
    %c0_3 = arith.constant 0 : index
    %5 = vector.load %arg3[%c0_2, %c0_3] : memref<1x2048xf32, #tpu.memory_space<vmem>>, vector<1x2048xf32>
    tpu.vector_store %arg3[%c0_2, %c0_3], %4 {strides = array<i32>} : memref<1x2048xf32, #tpu.memory_space<vmem>>, vector<1x2048xf32>,
    return
  }
  func.func @transform_0(%arg0: i32, %arg1: i32) -> (i32, i32) {
    %c0_i32 = arith.constant 0 : i32
    return %arg0, %arg1 : i32, i32
  }
  func.func @transform_1(%arg0: i32, %arg1: i32) -> (i32, i32) {
    %c0_i32 = arith.constant 0 : i32
    return %arg0, %arg1 : i32, i32
  }
}

</mosaic_0001>

<bundles_post_ra>
// kernel: tpu_custom_call.1
= control target key start
LH: loop header
LB: loop body
LE: loop exit
PB: predicated region body
PF: predicated region fallthrough
CT: control target
= control target key end

     0   :  { %6 = vsyncpa [#allocation3], 0  ;;  %s132_s0 = inlined_call_operand.hbm [shape: f32[1,2048], index: 0, kind: input, shape index: {}]   ;;  %s133_s1 = inlined_call_operand.hbm [shape: f32[1,2048], index: 1, kind: output, shape index: {}]  }
   0x1   :  { %7 = vsyncpa [#allocation4], 0  ;;  %s96_s6 = smov [#allocation2]   ;;  %s48_s10 = scalar_lea.hbm %s132_s0, 256 }
   0x2   :  { %s14_s7 = sshll.u32 %s96_s6, 4  ;;  %p49_p0 = scmp.ne.s32.totalorder %s132_s0, %s48_s10  ;;  %s15_s7 = int_to_ptr.vmem [resolvable:$true] %s14_s7 }
   0x3   :  { %p52_p1 = scmp.lt.u32.totalorder %s48_s10, %s132_s0 }
   0x5   :  { %p54_p2 = pnand %p52_p1, %p49_p0 }
   0x7   :  { %57 = shalt.err (!%p54_p2)
}
   0x8   :  { %s58_s15 = scalar_lea.vmem %s15_s7, 256  ;;  %p63_p4 = scmp.lt.s32.totalorder %s15_s7, %s15_s7 }
   0x9   :  { %p59_p3 = scmp.ne.s32.totalorder %s15_s7, %s58_s15  ;;  %p64_p5 = scmp.lt.s32.totalorder %s58_s15, %s58_s15 }
   0xb   :  { %p65_p6 = por %p64_p5, %p63_p4 }
   0xd   :  { %p66_p7 = pnand %p65_p6, %p59_p3 }
   0xf   :  { %69 = shalt.err (!%p66_p7)
}
  0x10   :  { %17 = dma.hbm_to_vmem [thread:$0]  %s132_s0, 256, %s15_s7, [#allocation3]  }
  0x11   :  { %92 = dma.done.wait [#allocation3], 256  }
  0x12   :  { %93 = vsyncadd [#allocation3], 4294967040  ;;  %v21_v0 = vld [vmem:[#allocation2] sm:$0xff]  ;;  %v22_v1 = vld [vmem:[#allocation2 + $0x8] sm:$0xff]  ;;  %s97_s18 = smov [#allocation5]  }
  0x13   :  { %s35_s19 = sshll.u32 %s97_s18, 4  ;;  %v23_v2 = vmul.f32 2.0, %v21_v0  ;;  %v24_v3 = vmul.f32 2.0, %v22_v1  ;;  %s36_s19 = int_to_ptr.vmem [resolvable:$true] %s35_s19 }
  0x14   :  { %s70_s20 = scalar_lea.vmem %s36_s19, 256  ;;  %p75_p9 = scmp.lt.s32.totalorder %s36_s19, %s36_s19 }
  0x15   :  { %v44_v4 = vadd.f32 -1.0, %v23_v2  ;;  %v45_v5 = vadd.f32 -1.0, %v24_v3  ;;  %p71_p8 = scmp.ne.s32.totalorder %s36_s19, %s70_s20  ;;  %p76_p10 = scmp.lt.s32.totalorder %s70_s20, %s70_s20 }
  0x17   :  { %27 = vst [vmem:[#allocation5] sm:$0xff] %v44_v4  ;;  %28 = vst [vmem:[#allocation5 + $0x8] sm:$0xff] %v45_v5  ;;  %p77_p11 = por %p76_p10, %p75_p9 }
  0x19   :  { %p78_p12 = pnand %p77_p11, %p71_p8 }
  0x1b   :  { %81 = shalt.err (!%p78_p12)
}
  0x1c   :  { %s82_s22 = scalar_lea.hbm %s133_s1, 256 }
  0x1d   :  { %p83_p13 = scmp.ne.s32.totalorder %s133_s1, %s82_s22  ;;  %p86_p0 = scmp.lt.u32.totalorder %s82_s22, %s133_s1 }
  0x1f   :  { %p88_p1 = pnand %p86_p0, %p83_p13 }
  0x21   :  { %91 = shalt.err (!%p88_p1)
}
  0x22   :  { %38 = dma.vmem_to_hbm [thread:$0]  %s36_s19, 256, %s133_s1, [#allocation4]  }
  0x23   :  { %94 = dma.done.wait [#allocation4], 256  }
  0x24   :  { %95 = vsyncadd [#allocation4], 4294967040 }
  0x25   :  { %42 = vsyncpa [#allocation3], 1 }
  0x26   :  { %43 = vsyncpa [#allocation4], 1 }

</bundles_post_ra>
